<compile_context>
chip_gen: v7x
topology: tpu7x:2x2x1
jax: 0.10.0
libtpu: 0.0.40
codegen_flags: <defaults>
</compile_context>

<pallas_src>
import functools
import math

import jax
import jax.numpy as jnp
from jax import lax
from jax.experimental import pallas as pl
from jax.experimental.pallas import tpu as pltpu


def _round_up(x, m):
    return ((x + m - 1) // m) * m


# ---------------------------------------------------------------------------
# Tiled linear: out = x @ w + b   (x, w in bf16; f32 accumulation)
# ---------------------------------------------------------------------------
def _linear_kernel(x_ref, w_ref, b_ref, o_ref, acc_ref):
    k = pl.program_id(2)

    @pl.when(k == 0)
    def _():
        acc_ref[...] = jnp.zeros_like(acc_ref)

    acc_ref[...] += jnp.dot(x_ref[...], w_ref[...],
                            preferred_element_type=jnp.float32)

    @pl.when(k == pl.num_programs(2) - 1)
    def _():
        o_ref[...] = (acc_ref[...] + b_ref[...]).astype(o_ref.dtype)


def _pallas_linear(x, w, b, *, out_dtype, tm=256, tn=256, tk=512):
    """x: (M, K) bf16, w: (K, N) bf16, b: (N,) -> (M, N) out_dtype."""
    M, K = x.shape
    N = w.shape[1]
    tm = min(tm, _round_up(M, 8))
    tn = min(tn, _round_up(N, 128))
    tk = min(tk, _round_up(K, 128))
    Mp, Kp, Np = _round_up(M, tm), _round_up(K, tk), _round_up(N, tn)
    if (Mp, Kp) != (M, K):
        x = jnp.pad(x, ((0, Mp - M), (0, Kp - K)))
    if (Kp, Np) != (K, N):
        w = jnp.pad(w, ((0, Kp - K), (0, Np - N)))
    b2 = jnp.pad(b.astype(jnp.float32), (0, Np - N)).reshape(1, Np)

    flops = 2 * Mp * Np * Kp
    bytes_acc = (Mp * Kp * x.dtype.itemsize + Kp * Np * w.dtype.itemsize
                 + Np * 4 + Mp * Np * jnp.dtype(out_dtype).itemsize)

    out = pl.pallas_call(
        _linear_kernel,
        out_shape=jax.ShapeDtypeStruct((Mp, Np), out_dtype),
        grid=(Mp // tm, Np // tn, Kp // tk),
        in_specs=[
            pl.BlockSpec((tm, tk), lambda i, j, k: (i, k)),
            pl.BlockSpec((tk, tn), lambda i, j, k: (k, j)),
            pl.BlockSpec((1, tn), lambda i, j, k: (0, j)),
        ],
        out_specs=pl.BlockSpec((tm, tn), lambda i, j, k: (i, j)),
        scratch_shapes=[pltpu.VMEM((tm, tn), jnp.float32)],
        compiler_params=pltpu.CompilerParams(
            dimension_semantics=("parallel", "parallel", "arbitrary"),
            vmem_limit_bytes=32 * 1024 * 1024),
        cost_estimate=pl.CostEstimate(flops=int(flops), transcendentals=0,
                                      bytes_accessed=int(bytes_acc)),
    )(x, w, b2)
    if (Mp, Np) != (M, N):
        out = out[:M, :N]
    return out


# ---------------------------------------------------------------------------
# RoPE kernel: rotates the Q and K head blocks of the fused qkv tensor.
# The 1/sqrt(head_dim) attention scale is folded into the Q heads here, so the
# flash loop never has to rescale the (tq x tkv) score tile.
# ---------------------------------------------------------------------------
def _rope_kernel(x_ref, cos_ref, sin_ref, o_ref, *, num_heads, scale):
    x = x_ref[0].astype(jnp.float32)          # (tq, D)
    cos = cos_ref[...]
    sin = sin_ref[...]
    d = x.shape[-1]
    col = lax.broadcasted_iota(jnp.int32, x.shape, 1)
    sign = jnp.where(col < (d // 2), -1.0, 1.0)
    rot = sign * pltpu.roll(x, shift=d // 2, axis=1)   # rotate_half via lane roll
    # grid axis 2: [0, num_heads) = Q heads (scaled), [num_heads, 2*num_heads) = K heads
    factor = jnp.where(pl.program_id(2) < num_heads, scale, 1.0)
    o_ref[0] = ((x * cos + rot * sin) * factor).astype(o_ref.dtype)


def _apply_rope(qkv3d, cos, sin, num_heads, head_dim, block_t, scale):
    B, Tp, _ = qkv3d.shape
    hidden = num_heads * head_dim
    kernel = functools.partial(_rope_kernel, num_heads=num_heads, scale=scale)
    return pl.pallas_call(
        kernel,
        out_shape=jax.ShapeDtypeStruct((B, Tp, 2 * hidden), qkv3d.dtype),
        grid=(B, Tp // block_t, 2 * num_heads),    # q heads then k heads
        in_specs=[
            pl.BlockSpec((1, block_t, head_dim), lambda b, t, j: (b, t, j)),
            pl.BlockSpec((block_t, head_dim), lambda b, t, j: (t, 0)),
            pl.BlockSpec((block_t, head_dim), lambda b, t, j: (t, 0)),
        ],
        out_specs=pl.BlockSpec((1, block_t, head_dim), lambda b, t, j: (b, t, j)),
        compiler_params=pltpu.CompilerParams(
            dimension_semantics=("parallel", "parallel", "parallel")),
    )(qkv3d, cos, sin)


# ---------------------------------------------------------------------------
# Flash attention kernel (causal, online softmax, in-register mask)
# ---------------------------------------------------------------------------
def _flash_attn_kernel(q_ref, k_ref, v_ref, o_ref, m_ref, l_ref, acc_ref):
    qi = pl.program_id(2)
    ki = pl.program_id(3)

    @pl.when(ki == 0)
    def _():
        m_ref[...] = jnp.full_like(m_ref, -1e30)
        l_ref[...] = jnp.zeros_like(l_ref)
        acc_ref[...] = jnp.zeros_like(acc_ref)

    def online_softmax_step(masked):
        q = q_ref[0]     # (tq, D) bf16, rotated and pre-scaled by 1/sqrt(D)
        k = k_ref[0]     # (tkv, D) bf16, rotated
        v = v_ref[0]     # (tkv, D) bf16
        # contract last dims directly (no k transpose)
        s = lax.dot_general(q, k, (((1,), (1,)), ((), ())),
                            preferred_element_type=jnp.float32)
        if masked:
            # diagonal tile: qi == ki, so local in-tile iotas suffice
            row = lax.broadcasted_iota(jnp.int32, s.shape, 0)
            col = lax.broadcasted_iota(jnp.int32, s.shape, 1)
            s = jnp.where(row >= col, s, -1e30)

        m_prev = m_ref[...]
        m_new = jnp.maximum(m_prev, jnp.max(s, axis=-1, keepdims=True))
        alpha = jnp.exp(m_prev - m_new)
        p = jnp.exp(s - m_new)
        l_ref[...] = alpha * l_ref[...] + jnp.sum(p, axis=-1, keepdims=True)
        acc_ref[...] = alpha * acc_ref[...] + lax.dot_general(
            p.astype(v.dtype), v, (((1,), (0,)), ((), ())),
            preferred_element_type=jnp.float32)
        m_ref[...] = m_new

    @pl.when(ki < qi)   # interior tile: fully visible, no mask work needed
    def _():
        online_softmax_step(masked=False)

    @pl.when(ki == qi)  # diagonal tile: causal mask, then normalize & write out
    def _():
        online_softmax_step(masked=True)
        inv_l = pl.reciprocal(l_ref[...], approx=True)
        o_ref[0] = (acc_ref[...] * inv_l).astype(o_ref.dtype)
    # kv tiles with ki > qi are fully masked: compute skipped, DMA deduped via the
    # clamped kv block index in the BlockSpecs below.


def _flash_attention(qk_rot, qkv, num_heads, head_dim, block_t):
    B, Tp, _ = qk_rot.shape
    n_t = Tp // block_t
    hidden = num_heads * head_dim

    # kv block index clamped to the diagonal tile: masked tiles re-use the previous
    # block index so their DMAs are deduped by the pipeline.
    q_spec = pl.BlockSpec((1, block_t, head_dim),
                          lambda b, h, qi, ki: (b, qi, h))
    k_spec = pl.BlockSpec((1, block_t, head_dim),
                          lambda b, h, qi, ki: (b, jnp.minimum(ki, qi), num_heads + h))
    v_spec = pl.BlockSpec((1, block_t, head_dim),
                          lambda b, h, qi, ki: (b, jnp.minimum(ki, qi), 2 * num_heads + h))
    o_spec = pl.BlockSpec((1, block_t, head_dim),
                          lambda b, h, qi, ki: (b, qi, h))

    flops = 2 * 2 * B * num_heads * Tp * Tp * head_dim
    bytes_acc = (qk_rot.size * qk_rot.dtype.itemsize + qkv.size * qkv.dtype.itemsize
                 + B * Tp * hidden * 2)

    return pl.pallas_call(
        _flash_attn_kernel,
        out_shape=jax.ShapeDtypeStruct((B, Tp, hidden), jnp.bfloat16),
        grid=(B, num_heads, n_t, n_t),
        in_specs=[q_spec, k_spec, v_spec],
        out_specs=o_spec,
        scratch_shapes=[pltpu.VMEM((block_t, 1), jnp.float32),
                        pltpu.VMEM((block_t, 1), jnp.float32),
                        pltpu.VMEM((block_t, head_dim), jnp.float32)],
        compiler_params=pltpu.CompilerParams(
            dimension_semantics=("parallel", "parallel", "parallel", "arbitrary"),
            vmem_limit_bytes=32 * 1024 * 1024),
        cost_estimate=pl.CostEstimate(flops=int(flops),
                                      transcendentals=int(B * num_heads * Tp * Tp),
                                      bytes_accessed=int(bytes_acc)),
    )(qk_rot, qk_rot, qkv)


# ---------------------------------------------------------------------------
# Module wrapper
# ---------------------------------------------------------------------------
def _rotary_cos_sin(seq_len, head_dim, base=10000.0, dtype=jnp.float32):
    inv_freq = 1.0 / (base ** (jnp.arange(0, head_dim, 2, dtype=jnp.float32) / head_dim))
    t = jnp.arange(seq_len, dtype=jnp.float32)
    freqs = jnp.outer(t, inv_freq)                  # (T, D/2)
    emb = jnp.concatenate([freqs, freqs], axis=-1)  # (T, D)
    return jnp.cos(emb).astype(dtype), jnp.sin(emb).astype(dtype)


def quant_llama_attention(hidden_states, w_qkv, b_qkv, w_o, b_o, num_heads,
                          *, block_t=256, tm=256, tn=256, tk=512):
    """Forward of QuantLlamaAttention (no kv-cache, causal mask, no attn weights out)."""
    bsz, q_len, hidden = hidden_states.shape
    head_dim = hidden // num_heads
    assert head_dim * num_heads == hidden
    # Head-major lane BlockSpecs require a lane-tileable head_dim (LLaMA uses 128).
    assert head_dim % 128 == 0, "this Pallas path assumes head_dim % 128 == 0"

    x_bf16 = hidden_states.astype(jnp.bfloat16)

    # --- fused QKV projection (tiled, bf16 MXU, f32 accumulate) ---
    qkv = _pallas_linear(x_bf16.reshape(bsz * q_len, hidden),
                         w_qkv.T.astype(jnp.bfloat16), b_qkv,
                         out_dtype=jnp.bfloat16, tm=tm, tn=tn, tk=tk)
    qkv = qkv.reshape(bsz, q_len, 3 * hidden)   # [q heads | k heads | v heads]

    # --- pad the sequence to a multiple of the attention tile ---
    block_t = min(block_t, _round_up(q_len, 8))
    Tp = _round_up(q_len, block_t)
    if Tp != q_len:
        qkv = jnp.pad(qkv, ((0, 0), (0, Tp - q_len), (0, 0)))

    # --- RoPE on Q/K heads, single pass; attention scale folded into Q ---
    cos, sin = _rotary_cos_sin(Tp, head_dim)
    scale = 1.0 / math.sqrt(head_dim)
    qk_rot = _apply_rope(qkv, cos, sin, num_heads, head_dim, block_t, scale)

    # --- flash attention, output written lane-dense in (B, T, H) ---
    attn = _flash_attention(qk_rot, qkv, num_heads, head_dim, block_t)
    attn = attn[:, :q_len]

    # --- output projection ---
    out = _pallas_linear(attn.reshape(bsz * q_len, hidden),
                         w_o.T.astype(jnp.bfloat16), b_o,
                         out_dtype=jnp.float32, tm=tm, tn=tn, tk=tk)
    return out.reshape(bsz, q_len, hidden)


# ---------------------------------------------------------------------------
# Pure-JAX f32 reference (mirrors the PyTorch forward with the causal mask)
# ---------------------------------------------------------------------------
def reference_attention(hidden_states, w_qkv, b_qkv, w_o, b_o, num_heads):
    bsz, q_len, hidden = hidden_states.shape
    head_dim = hidden // num_heads

    qkv = hidden_states @ w_qkv.T + b_qkv
    q, k, v = jnp.split(qkv, 3, axis=2)

    def shape(x):
        return x.reshape(bsz, q_len, num_heads, head_dim).transpose(0, 2, 1, 3)

    q, k, v = shape(q), shape(k), shape(v)
    cos, sin = _rotary_cos_sin(q_len, head_dim)

    def rotate_half(x):
        x1, x2 = x[..., : head_dim // 2], x[..., head_dim // 2:]
        return jnp.concatenate([-x2, x1], axis=-1)

    q = q * cos + rotate_half(q) * sin
    k = k * cos + rotate_half(k) * sin

    neg = jnp.finfo(jnp.float32).min
    causal = jnp.where(
        jnp.arange(q_len)[:, None] >= jnp.arange(q_len)[None, :], 0.0, neg)
    scores = jnp.einsum("bhqd,bhkd->bhqk", q, k) / math.sqrt(head_dim)
    scores = scores + causal[None, None]
    scores = jnp.maximum(scores, neg)
    probs = jax.nn.softmax(scores.astype(jnp.float32), axis=-1)
    attn = jnp.einsum("bhqk,bhkd->bhqd", probs, v)
    attn = attn.transpose(0, 2, 1, 3).reshape(bsz, q_len, hidden)
    return attn @ w_o.T + b_o


# ---------------------------------------------------------------------------
if __name__ == "__main__":
    bsz, q_len, num_heads, head_dim = 2, 16, 2, 128
    hidden = num_heads * head_dim   # 256, LLaMA-style head_dim = 128

    key = jax.random.PRNGKey(0)
    k_x, k_wqkv, k_bqkv, k_wo, k_bo = jax.random.split(key, 5)

    hidden_states = jax.random.normal(k_x, (bsz, q_len, hidden), dtype=jnp.float32)
    # torch.nn.Linear-style weights: (out_features, in_features)
    w_qkv = jax.random.normal(k_wqkv, (3 * hidden, hidden), dtype=jnp.float32) * 0.02
    b_qkv = jax.random.normal(k_bqkv, (3 * hidden,), dtype=jnp.float32) * 0.01
    w_o = jax.random.normal(k_wo, (hidden, hidden), dtype=jnp.float32) * 0.02
    b_o = jax.random.normal(k_bo, (hidden,), dtype=jnp.float32) * 0.01

    # block_t=8 -> 2x2 q/kv tile grid: exercises the online softmax, the unmasked
    # interior path, the causal diagonal path, and the kv-DMA dedup at toy length.
    out = quant_llama_attention(hidden_states, w_qkv, b_qkv, w_o, b_o, num_heads,
                                block_t=8)
    out = jax.block_until_ready(out)

    ref = reference_attention(hidden_states, w_qkv, b_qkv, w_o, b_o, num_heads)
    assert out.shape == (bsz, q_len, hidden)
    max_err = float(jnp.max(jnp.abs(out - ref)))
    assert jnp.allclose(out, ref, atol=2e-2, rtol=2e-2), (
        f"mismatch vs reference (max abs err = {max_err})")

    print("KERNEL_OK")
</pallas_src>

<mosaic_0001>
module attributes {stable_mosaic.version = 11 : i64} {
  func.func @_linear_kernel(%arg0: i32, %arg1: i32, %arg2: i32, %arg3: memref<32x256xbf16, #tpu.memory_space<vmem>>, %arg4: memref<256x256xbf16, #tpu.memory_space<vmem>>, %arg5: memref<1x256xf32, #tpu.memory_space<vmem>>, %arg6: memref<32x256xbf16, #tpu.memory_space<vmem>>, %arg7: memref<32x256xf32, #tpu.memory_space<vmem>>) attributes {dimension_semantics = [#tpu.dimension_semantics<parallel>, #tpu.dimension_semantics<parallel>, #tpu.dimension_semantics<arbitrary>], iteration_bounds = array<i64: 1, 3, 1>, scalar_prefetch = 0 : i64, scratch_operands = 1 : i64, tpu.core_type = #tpu.core_type<tc>, window_params = [{transform_indices = @transform_0, window_bounds = array<i64: 32, 256>}, {transform_indices = @transform_1, window_bounds = array<i64: 256, 256>}, {transform_indices = @transform_2, window_bounds = array<i64: 1, 256>}, {transform_indices = @transform_3, window_bounds = array<i64: 32, 256>}]} {
    %c0_i32 = arith.constant 0 : i32
    %0 = arith.cmpi eq, %arg2, %c0_i32 : i32
    %1 = arith.extui %0 : i1 to i32
    %c0_i32_0 = arith.constant 0 : i32
    %2 = arith.cmpi ne, %1, %c0_i32_0 : i32
    scf.if %2 {
      %cst_10 = arith.constant 0.000000e+00 : f32
      %12 = vector.broadcast %cst_10 : f32 to vector<32x256xf32>
      %c0_11 = arith.constant 0 : index
      %c0_12 = arith.constant 0 : index
      %13 = vector.load %arg7[%c0_11, %c0_12] : memref<32x256xf32, #tpu.memory_space<vmem>>, vector<32x256xf32>
      tpu.vector_store %arg7[%c0_11, %c0_12], %12 {strides = array<i32>} : memref<32x256xf32, #tpu.memory_space<vmem>>, vector<32x256xf32>,
    } else {
    }
    %c0 = arith.constant 0 : index
    %c0_1 = arith.constant 0 : index
    %3 = vector.load %arg7[%c0, %c0_1] : memref<32x256xf32, #tpu.memory_space<vmem>>, vector<32x256xf32>
    %c0_2 = arith.constant 0 : index
    %c0_3 = arith.constant 0 : index
    %4 = vector.load %arg3[%c0_2, %c0_3] : memref<32x256xbf16, #tpu.memory_space<vmem>>, vector<32x256xbf16>
    %c0_4 = arith.constant 0 : index
    %c0_5 = arith.constant 0 : index
    %5 = vector.load %arg4[%c0_4, %c0_5] : memref<256x256xbf16, #tpu.memory_space<vmem>>, vector<256x256xbf16>
    %cst = arith.constant dense<0.000000e+00> : vector<32x256xf32>
    %6 = tpu.matmul %4, %5, %cst {dimension_numbers = #tpu.dot_dimension_numbers<[1], [0], [0], [1], [0, 0, 1, 1], [], []>} : vector<32x256xbf16>, vector<256x256xbf16>, vector<32x256xf32> -> vector<32x256xf32>
    %7 = arith.addf %3, %6 : vector<32x256xf32>
    %c0_6 = arith.constant 0 : index
    %c0_7 = arith.constant 0 : index
    %8 = vector.load %arg7[%c0_6, %c0_7] : memref<32x256xf32, #tpu.memory_space<vmem>>, vector<32x256xf32>
    tpu.vector_store %arg7[%c0_6, %c0_7], %7 {strides = array<i32>} : memref<32x256xf32, #tpu.memory_space<vmem>>, vector<32x256xf32>,
    %c0_i32_8 = arith.constant 0 : i32
    %9 = arith.cmpi eq, %arg2, %c0_i32_8 : i32
    %10 = arith.extui %9 : i1 to i32
    %c0_i32_9 = arith.constant 0 : i32
    %11 = arith.cmpi ne, %10, %c0_i32_9 : i32
    scf.if %11 {
      %c0_10 = arith.constant 0 : index
      %c0_11 = arith.constant 0 : index
      %12 = vector.load %arg7[%c0_10, %c0_11] : memref<32x256xf32, #tpu.memory_space<vmem>>, vector<32x256xf32>
      %c0_12 = arith.constant 0 : index
      %c0_13 = arith.constant 0 : index
      %13 = vector.load %arg5[%c0_12, %c0_13] : memref<1x256xf32, #tpu.memory_space<vmem>>, vector<1x256xf32>
      %14 = vector.broadcast %13 : vector<1x256xf32> to vector<32x256xf32>
      %15 = arith.addf %12, %14 : vector<32x256xf32>
      %16 = arith.truncf %15 : vector<32x256xf32> to vector<32x256xbf16>
      %c0_14 = arith.constant 0 : index
      %c0_15 = arith.constant 0 : index
      %17 = vector.load %arg6[%c0_14, %c0_15] : memref<32x256xbf16, #tpu.memory_space<vmem>>, vector<32x256xbf16>
      tpu.vector_store %arg6[%c0_14, %c0_15], %16 {strides = array<i32>} : memref<32x256xbf16, #tpu.memory_space<vmem>>, vector<32x256xbf16>,
    } else {
    }
    return
  }
  func.func @transform_0(%arg0: i32, %arg1: i32, %arg2: i32) -> (i32, i32) {
    %c0_i32 = arith.constant 0 : i32
    return %arg0, %arg2 : i32, i32
  }
  func.func @transform_1(%arg0: i32, %arg1: i32, %arg2: i32) -> (i32, i32) {
    %c0_i32 = arith.constant 0 : i32
    return %arg2, %arg1 : i32, i32
  }
  func.func @transform_2(%arg0: i32, %arg1: i32, %arg2: i32) -> (i32, i32) {
    %c0_i32 = arith.constant 0 : i32
    %c0_i32_0 = arith.constant 0 : i32
    return %c0_i32, %arg1 : i32, i32
  }
  func.func @transform_3(%arg0: i32, %arg1: i32, %arg2: i32) -> (i32, i32) {
    %c0_i32 = arith.constant 0 : i32
    return %arg0, %arg1 : i32, i32
  }
}

</mosaic_0001>

<bundles_post_ra>
// kernel: tpu_custom_call.1
= control target key start
LH: loop header
LB: loop body
LE: loop exit
PB: predicated region body
PF: predicated region fallthrough
CT: control target
= control target key end

     0   :  { %8 = vsyncpa [#allocation4], 0  ;;  %s1424_s0 = inlined_call_operand.hbm [shape: bf16[32,256], index: 0, kind: input, shape index: {}]   ;;  %s1425_s1 = inlined_call_operand.hbm [shape: bf16[256,768], index: 1, kind: input, shape index: {}]   ;;  %s1426_s2 = inlined_call_operand.vmem [shape: f32[1,768], index: 2, kind: input, shape index: {}]   ;;  %s1427_s3 = inlined_call_operand.hbm [shape: bf16[32,768], index: 3, kind: output, shape index: {}]  }
   0x1   :  { %9 = vsyncpa [#allocation7], 0 }
   0x2   :  { %11 = vsyncpa [#allocation7 + $0x1], 0 }
   0x3   :  { %12 = vsyncpa [#allocation5], 0 }
   0x4   :  { %14 = vsyncpa [#allocation5 + $0x1], 0  ;;  %s1169_s12 = smov 0   ;;  %s1171_s13 = smov 0  }
   0x5   :  { %s1173_s14 = smov 0   ;;  %s1175_s15 = smov 0  }
   0x6   :  { %s1177_s16 = smov 0   ;;  %s1179_s17 = smov 0  }
   0x7 LB: > { %s765_s18 = sadd.s32 4294967295, %s1138_s17   ;;  %s766_s19 = sadd.s32 4294967294, %s1138_s17   ;;  %s1138_s17 = sphi %s1179_s17, %s20_s17   ;;  %s1134_s16 = sphi %s1177_s16, %s1454_s16   ;;  %s1130_s15 = sphi %s1175_s15, %s1453_s15   ;;  %s1126_s14 = sphi %s1173_s14, %s1452_s14   ;;  %s1122_s13 = sphi %s1171_s13, %s1451_s13   ;;  %s1118_s12 = sphi %s1169_s12, %s1450_s12  }
   0x8   : > { %p83_p0 = scmp.ne.s32.totalorder %s1126_s14, %s1122_s13  ;;  %p84_p1 = scmp.eq.s32.totalorder %s1138_s17, 0 }
   0x9   : > { %p89_p2 = scmp.ne.s32.totalorder %s1122_s13, %s1118_s12  ;;  %p1206_p3 = scmp.eq.s32.totalorder %s765_s18, 0 }
   0xa   : > { %p1210_p4 = por %p84_p1, %p83_p0  ;;  %p141_p5 = scmp.eq.s32.totalorder %s765_s18, 2 }
   0xb   : > { %s1435_s20 = scalar_select %p1206_p3, 1, 0 }
   0xc   : > { %p1216_p6 = por %p1206_p3, %p89_p2  ;;  %p147_p7 = scmp.eq.s32.totalorder %s766_s19, 2 }
   0xd   : > { %p1220_p8 = por %p141_p5, %p83_p0  ;;  %p767_p9 = scmp.ge.s32.totalorder %s1138_s17, 1 }
   0xe   : > { %s1437_s22 = scalar_select %p1216_p6, 1, 0 }
   0xf   : > { %s1438_s23 = scalar_select %p1220_p8, 1, 0 }
  0x10   : > { %p1225_p10 = por %p147_p7, %p89_p2  ;;  %p154_p11 = scmp.lt.s32.totalorder %s1138_s17, 4 }
  0x11   : > { %s1140_s26 = smov [#allocation3]   ;;  %p882_p0 = scmp.lt.s32.totalorder %s1138_s17, 3 }
  0x12   : > { %s1439_s24 = scalar_select %p1225_p10, 1, 0 }
  0x13   : > { %p1230_p12 = pnand %p767_p9, %p154_p11  ;;  %s172_s27 = sshll.u32 %s1140_s26, 4  ;;  %s173_s27 = int_to_ptr.vmem [resolvable:$true] %s172_s27 }
  0x14   : > { %p1245_p2 = pnand %p882_p0, %p1210_p4  ;;  %s35_s30 = sadd.s32 1, %s1134_s16 }
  0x15   : > { %s1440_s25 = scalar_select %p1230_p12, 1, 0 }
  0x16   : > { %p869_p13 = pneg %p1230_p12  ;;  %s994_s6 = scalar_lea.hbm %s1424_s0, 512 }
  0x17   : > { %s1442_s29 = scalar_select %p1245_p2, 1, 0 }
  0x18   : > { %p1239_p1 = pnand %p869_p13, %p1206_p3  ;;  %p995_p5 = scmp.ne.s32.totalorder %s1424_s0, %s994_s6 }
  0x19   : > { %p1001_p4 = scmp.lt.u32.totalorder %s994_s6, %s1424_s0 }
  0x1a   : > { %p996_p7 = pneg %p1239_p1 }
  0x1c   : > { %p997_p9 = pnand %p996_p7, %p995_p5 }
  0x1e   : > { %p998_p11 = pneg %p997_p9 }
  0x20   : > { %p1003_p13 = pnand %p1001_p4, %p998_p11 }
  0x22   : > { %1006 = shalt.err (!%p1003_p13)
}
  0x23   : > { %s1007_s11 = scalar_lea.vmem %s173_s27, 512  ;;  %p1015_p6 = scmp.lt.s32.totalorder %s173_s27, %s173_s27 }
  0x24   : > { %p1008_p0 = scmp.ne.s32.totalorder %s173_s27, %s1007_s11  ;;  %p1016_p3 = scmp.lt.s32.totalorder %s1007_s11, %s1007_s11 }
  0x26   : > { %p1010_p10 = pnand %p1008_p0, %p996_p7  ;;  %p1017_p12 = por %p1016_p3, %p1015_p6 }
  0x28   : > { %p1011_p8 = pneg %p1010_p10 }
  0x2a   : > { %p1018_p2 = pnand %p1017_p12, %p1011_p8 }
  0x2c   : > { %1021 = shalt.err (!%p1018_p2)
}
  0x2d   : > { %s1434_s18 = smov 128   ;;  %s1142_s19 = smov 8  }
  0x2e   : > { %872 = dma.hbm_to_vmem [thread:$0]  (!%p1239_p1), %s1424_s0, 512, %s173_s27, [#allocation4], %s1434_s18, %s1434_s18, %s1142_s19  }
  0x2f   : > { %p37_p10 = scmp.ge.s32.totalorder %s35_s30, 3  ;;  %s76_s4 = sadd.s32 1, %s1126_s14 }
  0x30   : > { %s186_s5 = sand.u32 1, %s1126_s14   ;;  %s823_s8 = sshll.u32 %s1134_s16, 7 }
  0x31   : > { %s1456_s30 = smov (%p37_p10, %s35_s30), 0  ;;  %s770_s6 = sshll.u32 %s186_s5, 8 }
  0x32   : > { %s72_s7 = ssub.s32 %s1134_s16, %s1456_s30  ;;  %s1279_s10 = scalar_lea.hbm %s1425_s1, %s823_s8 }
  0x33   : > { %p74_p3 = scmp.eq.s32.totalorder %s72_s7, 0  ;;  %s190_s27 = scalar_lea.vmem [#allocation6], %s770_s6 }
  0x34   : > { %s200_s11 = sshll.u32 %s190_s27, 4  ;;  %s1286_s26 = scalar_lea.sflag [#allocation7], %s186_s5  ;;  %s1284_s11 = int_to_ptr.vmem [resolvable:$true] %s200_s11 }
  0x35   : > { %s1282_s21 = scalar_select %p74_p3, %s1126_s14, %s76_s4  }
  0x36   : > { %s1022_s18 = scalar_lea.hbm %s1279_s10, 4096  ;;  %p1443_p8 = scmp.ne.s32.totalorder %s1442_s29, 0 }
  0x37   : > { %p1023_p6 = scmp.ne.s32.totalorder %s1279_s10, %s1022_s18  ;;  %s1027_s28 = scalar_lea.hbm %s1425_s1, 12288 }
  0x38   : > { %p1024_p12 = pneg %p1443_p8  ;;  %p1028_p5 = scmp.lt.u32.totalorder %s1279_s10, %s1425_s1 }
  0x39   : > { %p1029_p7 = scmp.lt.u32.totalorder %s1027_s28, %s1022_s18  ;;  %p1031_p11 = scmp.lt.u32.totalorder %s1022_s18, %s1279_s10 }
  0x3a   : > { %p1025_p1 = pnand %p1024_p12, %p1023_p6 }
  0x3b   : > { %p1030_p9 = por %p1029_p7, %p1028_p5 }
  0x3c   : > { %p1026_p2 = pneg %p1025_p1 }
  0x3d   : > { %p1032_p4 = por %p1031_p11, %p1030_p9 }
  0x3f   : > { %p1033_p13 = pnand %p1032_p4, %p1026_p2 }
  0x41   : > { %1036 = shalt.err (!%p1033_p13)
}
  0x42   : > { %s1037_s4 = scalar_lea.vmem %s1284_s11, 4096  ;;  %s1143_s5 = smov [#allocation6]  }
  0x43   : > { %p1038_p0 = scmp.ne.s32.totalorder %s1284_s11, %s1037_s4  ;;  %s1042_s27 = sshll.u32 %s1143_s5, 4  ;;  %s1043_s27 = int_to_ptr.vmem [resolvable:$false] %s1042_s27 }
  0x44   : > { %s1044_s7 = scalar_lea.vmem %s1043_s27, 8192  ;;  %p1045_p6 = scmp.lt.s32.totalorder %s1284_s11, %s1043_s27 }
  0x45   : > { %p1040_p10 = pnand %p1038_p0, %p1024_p12  ;;  %p1046_p1 = scmp.lt.s32.totalorder %s1044_s7, %s1037_s4 }
  0x47   : > { %p1041_p3 = pneg %p1040_p10  ;;  %p1047_p5 = por %p1046_p1, %p1045_p6 }
  0x49   : > { %p1048_p7 = pnand %p1047_p5, %p1041_p3 }
  0x4b   : > { %1051 = shalt.err (!%p1048_p7)
}
  0x4c   : > { %s1144_s18 = smov 384   ;;  %s1444_s8 = smov 128  }
  0x4d   : > { %876 = dma.hbm_to_vmem [thread:$0]  (!%p1443_p8), %s1279_s10, 4096, %s1284_s11, %s1286_s26, %s1144_s18, %s1444_s8, %s1142_s19  }
  0x4e   : > { %p1445_p12 = scmp.ne.s32.totalorder %s1440_s25, 0 }
  0x4f   : > { %p1446_p2 = scmp.ne.s32.totalorder (!%p1445_p12), %s1435_s20, 0 }
  0x50   : > { %220 = sbr.rel (%p1445_p12) target bundleno = 392 (0x188), region = 32 }
  0x57   : > { %1105 = dma.done.wait (%p1446_p2), [#allocation4], 512  }
  0x58   : > { %1107 = vsyncadd (%p1446_p2), [#allocation4], 4294966784  ;;  %s1323_s28 = sand.u32 1, %s1122_s13   ;;  %p1447_p8 = scmp.ne.s32.totalorder %s1437_s22, 0 }
  0x59   : > { %s775_s29 = sshll.u32 %s1323_s28, 8  ;;  %s227_s6 = scalar_lea.sflag [#allocation7], %s1323_s28 }
  0x5a   : > { %s1327_s9 = scalar_lea.vmem [#allocation6], %s775_s29 }
  0x5b   : > { %1109 = dma.done.wait (%p1447_p8), %s227_s6, 4096  }
  0x5c   : > { %1111 = vsyncadd (%p1447_p8), %s227_s6, 4294963200  ;;  %v940_v0 = vld [vmem:[%s1327_s9 + $0x4] ss:$8 sps:$4 sm:$0xff]   ;;  %v942_v1 = vld [vmem:[%s1327_s9] ss:$8 sps:$4 sm:$0xff]   ;;  %s777_s20 = sshll.u32 %s1130_s15, 1  ;;  %v586_v36 = vlaneseq }
  0x5d   : > { %504 = vmatprep.subr.bf16.mxu0 %v940_v0  ;;  %829 = vmatprep.subr.bf16.mxu1 %v940_v0  ;;  %v943_v2 = vld [vmem:[%s1327_s9 + $0x14] ss:$8 sps:$4 sm:$0xff]   ;;  %v945_v3 = vld [vmem:[%s1327_s9 + $0x10] ss:$8 sps:$4 sm:$0xff]   ;;  %v946_v4 = vld [vmem:[%s1327_s9 + $0x24] ss:$8 sps:$4 sm:$0xff]  }
  0x5e   : > { %505 = vmatpush1.bf16.msra.mxu0 %v942_v1  ;;  %845 = vmatpush1.bf16.msra.mxu1 %v942_v1  ;;  %v948_v5 = vld [vmem:[%s1327_s9 + $0x20] ss:$8 sps:$4 sm:$0xff]   ;;  %v949_v6 = vld [vmem:[%s1327_s9 + $0x34] ss:$8 sps:$4 sm:$0xff]   ;;  %v951_v7 = vld [vmem:[%s1327_s9 + $0x30] ss:$8 sps:$4 sm:$0xff]  }
  0x5f   : > { %506 = vmatprep.subr.bf16.mxu0 %v943_v2  ;;  %830 = vmatprep.subr.bf16.mxu1 %v943_v2  ;;  %v952_v8 = vld [vmem:[%s1327_s9 + $0x44] ss:$8 sps:$4 sm:$0xff]   ;;  %v954_v9 = vld [vmem:[%s1327_s9 + $0x40] ss:$8 sps:$4 sm:$0xff]   ;;  %v955_v10 = vld [vmem:[%s1327_s9 + $0x54] ss:$8 sps:$4 sm:$0xff]  }
  0x60   : > { %v957_v11 = vld [vmem:[%s1327_s9 + $0x50] ss:$8 sps:$4 sm:$0xff]   ;;  %v958_v12 = vld [vmem:[%s1327_s9 + $0x64] ss:$8 sps:$4 sm:$0xff]   ;;  %v960_v14 = vld [vmem:[%s1327_s9 + $0x60] ss:$8 sps:$4 sm:$0xff]  }
  0x61   : > { %v990_v13 = vld [vmem:[#allocation3 + $0x4] ss:$8 sps:$4 sm:$0xff]   ;;  %v993_v15 = vld [vmem:[#allocation3 + $0x14] ss:$8 sps:$4 sm:$0xff]   ;;  %v963_v17 = vld [vmem:[%s1327_s9 + $0x70] ss:$8 sps:$4 sm:$0xff]  }
  0x62   : > { %507 = vmatpush1.bf16.msra.mxu0 %v945_v3  ;;  %846 = vmatpush1.bf16.msra.mxu1 %v945_v3  ;;  %v961_v16 = vld [vmem:[%s1327_s9 + $0x74] ss:$8 sps:$4 sm:$0xff]   ;;  %v964_v18 = vld [vmem:[%s1327_s9 + $0x84] ss:$8 sps:$4 sm:$0xff]   ;;  %v966_v19 = vld [vmem:[%s1327_s9 + $0x80] ss:$8 sps:$4 sm:$0xff]  }
  0x63   : > { %508 = vmatprep.subr.bf16.mxu0 %v946_v4  ;;  %831 = vmatprep.subr.bf16.mxu1 %v946_v4  ;;  %v967_v20 = vld [vmem:[%s1327_s9 + $0x94] ss:$8 sps:$4 sm:$0xff]   ;;  %v969_v21 = vld [vmem:[%s1327_s9 + $0x90] ss:$8 sps:$4 sm:$0xff]   ;;  %v970_v22 = vld [vmem:[%s1327_s9 + $0xa4] ss:$8 sps:$4 sm:$0xff]  }
  0x64   : > { %536 = vmatprep.mubr.bf16.mxu0 %v990_v13  ;;  %546 = vmatprep.mubr.bf16.mxu1 %v993_v15  ;;  %v972_v23 = vld [vmem:[%s1327_s9 + $0xa0] ss:$8 sps:$4 sm:$0xff]   ;;  %v973_v24 = vld [vmem:[%s1327_s9 + $0xb4] ss:$8 sps:$4 sm:$0xff]   ;;  %v975_v25 = vld [vmem:[%s1327_s9 + $0xb0] ss:$8 sps:$4 sm:$0xff]  }
  0x65   : > { %v976_v26 = vld [vmem:[%s1327_s9 + $0xc4] ss:$8 sps:$4 sm:$0xff]   ;;  %v978_v27 = vld [vmem:[%s1327_s9 + $0xc0] ss:$8 sps:$4 sm:$0xff]   ;;  %v979_v28 = vld [vmem:[%s1327_s9 + $0xd4] ss:$8 sps:$4 sm:$0xff]  }
  0x66   : > { %509 = vmatpush1.bf16.msra.mxu0 %v948_v5  ;;  %847 = vmatpush1.bf16.msra.mxu1 %v948_v5  ;;  %v981_v29 = vld [vmem:[%s1327_s9 + $0xd0] ss:$8 sps:$4 sm:$0xff]   ;;  %v982_v30 = vld [vmem:[%s1327_s9 + $0xe4] ss:$8 sps:$4 sm:$0xff]   ;;  %v984_v31 = vld [vmem:[%s1327_s9 + $0xe0] ss:$8 sps:$4 sm:$0xff]  }
  0x67   : > { %510 = vmatprep.subr.bf16.mxu0 %v949_v6  ;;  %832 = vmatprep.subr.bf16.mxu1 %v949_v6  ;;  %v985_v32 = vld [vmem:[%s1327_s9 + $0xf4] ss:$8 sps:$4 sm:$0xff]   ;;  %v987_v33 = vld [vmem:[%s1327_s9 + $0xf0] ss:$8 sps:$4 sm:$0xff]   ;;  %v988_v34 = vld [vmem:[#allocation3] ss:$8 sps:$4 sm:$0xff]  }
  0x68   : > { %v991_v35 = vld [vmem:[#allocation3 + $0x10] ss:$8 sps:$4 sm:$0xff]   ;;  %p262_p9 = scmp.lt.s32.totalorder %s777_s20, 5  ;;  %v587_v37 = vshrl.u32 %v586_v36, 7  ;;  %s776_s10 = sshll.u32 %s1323_s28, 5 }
  0x69   : > { %s256_s11 = scalar_lea.vmem [#allocation8], %s776_s10  ;;  %s828_s4 = sshll.u32 %s1130_s15, 7 }
  0x6a   : > { %511 = vmatpush1.bf16.msra.mxu0 %v951_v7  ;;  %848 = vmatpush1.bf16.msra.mxu1 %v951_v7  ;;  %s1458_s20 = smov (!%p262_p9, %s777_s20), 5  ;;  %v588_v38 = vsub.s32 0, %v587_v37  ;;  %v592_v40 = vsub.s32 1, %v587_v37  ;;  %s649_s26 = sshll.u32 %s256_s11, 4  ;;  %s1371_s26 = int_to_ptr.vmem [resolvable:$true] %s649_s26 }
  0x6b   : > { %512 = vmatprep.subr.bf16.mxu0 %v952_v8  ;;  %833 = vmatprep.subr.bf16.mxu1 %v952_v8  ;;  %s264_s19 = scalar_lea.vmem %s1426_s2, %s1458_s20  ;;  %s1376_s7 = scalar_lea.hbm %s1427_s3, %s828_s4 }
  0x6c   : > { %v584_v39 = vld [vmem:[%s264_s19] sm:$0x3]  ;;  %s633_s15 = scalar_lea.sflag [#allocation5], %s1323_s28  ;;  %s1052_s18 = scalar_lea.vmem %s1371_s26, 512 }
  0x6d   : > { %v589_v41 = vrot.slane %v584_v39, %v588_v38  ;;  %v593_v42 = vrot.slane %v584_v39, %v592_v40  ;;  %p1053_p11 = scmp.ne.s32.totalorder %s1371_s26, %s1052_s18  ;;  %p1448_p4 = scmp.ne.s32.totalorder %s1438_s23, 0 }
  0x6e   : > { %513 = vmatpush1.bf16.msra.mxu0 %v954_v9  ;;  %849 = vmatpush1.bf16.msra.mxu1 %v954_v9  ;;  %s1145_s8 = smov [#allocation8]  }
  0x6f   : > { %514 = vmatprep.subr.bf16.mxu0 %v955_v10  ;;  %834 = vmatprep.subr.bf16.mxu1 %v955_v10  ;;  %p1054_p13 = pnand %p1053_p11, %p1448_p4  ;;  %s1056_s29 = sshll.u32 %s1145_s8, 4  ;;  %s1057_s29 = int_to_ptr.vmem [resolvable:$false] %s1056_s29 }
  0x70   : > { %s1058_s6 = scalar_lea.vmem %s1057_s29, 1024  ;;  %p1059_p10 = scmp.lt.s32.totalorder %s1371_s26, %s1057_s29 }
  0x71   : > { %p1055_p0 = pneg %p1054_p13  ;;  %p1060_p3 = scmp.lt.s32.totalorder %s1058_s6, %s1052_s18 }
  0x72   : > { %515 = vmatpush1.bf16.msra.mxu0 %v957_v11  ;;  %850 = vmatpush1.bf16.msra.mxu1 %v957_v11 }
  0x73   : > { %516 = vmatprep.subr.bf16.mxu0 %v958_v12  ;;  %835 = vmatprep.subr.bf16.mxu1 %v958_v12  ;;  %p1061_p6 = por %p1060_p3, %p1059_p10 }
  0x75   : > { %p1062_p1 = pnand %p1061_p6, %p1055_p0 }
  0x76   : > { %517 = vmatpush1.bf16.msra.mxu0 %v960_v14  ;;  %851 = vmatpush1.bf16.msra.mxu1 %v960_v14 }
  0x77   : > { %518 = vmatprep.subr.bf16.mxu0 %v961_v16  ;;  %836 = vmatprep.subr.bf16.mxu1 %v961_v16 }
  0x7a   : > { %519 = vmatpush1.bf16.msra.mxu0 %v963_v17  ;;  %852 = vmatpush1.bf16.msra.mxu1 %v963_v17 }
  0x7b   : > { %520 = vmatprep.subr.bf16.mxu0 %v964_v18  ;;  %837 = vmatprep.subr.bf16.mxu1 %v964_v18 }
  0x7e   : > { %521 = vmatpush1.bf16.msra.mxu0 %v966_v19  ;;  %853 = vmatpush1.bf16.msra.mxu1 %v966_v19 }
  0x7f   : > { %522 = vmatprep.subr.bf16.mxu0 %v967_v20  ;;  %838 = vmatprep.subr.bf16.mxu1 %v967_v20 }
  0x82   : > { %523 = vmatpush1.bf16.msra.mxu0 %v969_v21  ;;  %854 = vmatpush1.bf16.msra.mxu1 %v969_v21 }
  0x83   : > { %524 = vmatprep.subr.bf16.mxu0 %v970_v22  ;;  %839 = vmatprep.subr.bf16.mxu1 %v970_v22 }
  0x86   : > { %525 = vmatpush1.bf16.msra.mxu0 %v972_v23  ;;  %855 = vmatpush1.bf16.msra.mxu1 %v972_v23 }
  0x87   : > { %526 = vmatprep.subr.bf16.mxu0 %v973_v24  ;;  %840 = vmatprep.subr.bf16.mxu1 %v973_v24 }
  0x8a   : > { %527 = vmatpush1.bf16.msra.mxu0 %v975_v25  ;;  %856 = vmatpush1.bf16.msra.mxu1 %v975_v25 }
  0x8b   : > { %528 = vmatprep.subr.bf16.mxu0 %v976_v26  ;;  %841 = vmatprep.subr.bf16.mxu1 %v976_v26 }
  0x8e   : > { %529 = vmatpush1.bf16.msra.mxu0 %v978_v27  ;;  %857 = vmatpush1.bf16.msra.mxu1 %v978_v27 }
  0x8f   : > { %530 = vmatprep.subr.bf16.mxu0 %v979_v28  ;;  %842 = vmatprep.subr.bf16.mxu1 %v979_v28 }
  0x92   : > { %531 = vmatpush1.bf16.msra.mxu0 %v981_v29  ;;  %858 = vmatpush1.bf16.msra.mxu1 %v981_v29 }
  0x93   : > { %532 = vmatprep.subr.bf16.mxu0 %v982_v30  ;;  %843 = vmatprep.subr.bf16.mxu1 %v982_v30 }
  0x96   : > { %533 = vmatpush1.bf16.msra.mxu0 %v984_v31  ;;  %859 = vmatpush1.bf16.msra.mxu1 %v984_v31 }
  0x97   : > { %534 = vmatprep.subr.bf16.mxu0 %v985_v32  ;;  %844 = vmatprep.subr.bf16.mxu1 %v985_v32 }
  0x9a   : > { %535 = vmatpush1.bf16.msra.mxu0 %v987_v33  ;;  %860 = vmatpush1.bf16.msra.mxu1 %v987_v33 }
  0x9d   : > { %537 = vmatmul.mubr.bf16.vlgmr.msra.gmra.mrb[0].mxu0 %v988_v34  ;;  %547 = vmatmul.mubr.bf16.vlgmr.msra.gmra.mrb[0].mxu1 %v991_v35 }
 0x170   : > { %v538_v43 = vpop.f32.mrb[0].mxu0  ;;  %v548_v44 = vpop.f32.mrb[0].mxu1 }
 0x171   : > { %v596_v45 = vadd.f32 %v589_v41, %v538_v43  ;;  %v600_v46 = vadd.f32 %v589_v41, %v548_v44  ;;  %v540_v47 = vpop.f32.mrb[1].mxu0  ;;  %v550_v48 = vpop.f32.mrb[1].mxu1 }
 0x172   : > { %v597_v49 = vadd.f32 %v593_v42, %v540_v47  ;;  %v601_v50 = vadd.f32 %v593_v42, %v550_v48  ;;  %v542_v51 = vpop.f32.mrb[2].mxu0  ;;  %v552_v52 = vpop.f32.mrb[2].mxu1 }
 0x173   : > { %v598_v53 = vadd.f32 %v589_v41, %v542_v51  ;;  %v602_v54 = vadd.f32 %v589_v41, %v552_v52  ;;  %v544_v55 = vpop.f32.mrb[3].mxu0  ;;  %v554_v56 = vpop.f32.mrb[3].mxu1 }
 0x174   : > { %v824_v57 = vpack.c.bf16 %v597_v49, %v596_v45  ;;  %v826_v58 = vpack.c.bf16 %v601_v50, %v600_v46  ;;  %v599_v59 = vadd.f32 %v593_v42, %v544_v55  ;;  %v603_v60 = vadd.f32 %v593_v42, %v554_v56 }
 0x176   : > { %628 = vst [vmem:[%s256_s11] sm:$0xff] %v824_v57  ;;  %630 = vst [vmem:[%s256_s11 + $0x10] sm:$0xff] %v826_v58  ;;  %v825_v61 = vpack.c.bf16 %v599_v59, %v598_v53  ;;  %v827_v62 = vpack.c.bf16 %v603_v60, %v602_v54 }
 0x178   : > { %629 = vst [vmem:[%s256_s11 + $0x8] sm:$0xff] %v825_v61  ;;  %631 = vst [vmem:[%s256_s11 + $0x18] sm:$0xff] %v827_v62 }
 0x179   : > { %1065 = shalt.err (!%p1062_p1)
}
 0x17a   : > { %s1066_s9 = scalar_lea.hbm %s1376_s7, 512  ;;  %s1070_s25 = scalar_lea.hbm %s1427_s3, 1536 }
 0x17b   : > { %p1067_p5 = scmp.ne.s32.totalorder %s1376_s7, %s1066_s9  ;;  %p1071_p2 = scmp.lt.u32.totalorder %s1376_s7, %s1427_s3 }
 0x17c   : > { %p1072_p8 = scmp.lt.u32.totalorder %s1070_s25, %s1066_s9  ;;  %p1074_p11 = scmp.lt.u32.totalorder %s1066_s9, %s1376_s7 }
 0x17d   : > { %p1068_p7 = pnand %p1067_p5, %p1448_p4 }
 0x17e   : > { %p1073_p9 = por %p1072_p8, %p1071_p2 }
 0x17f   : > { %p1069_p12 = pneg %p1068_p7 }
 0x180   : > { %p1075_p13 = por %p1074_p11, %p1073_p9 }
 0x182   : > { %p1076_p0 = pnand %p1075_p13, %p1069_p12 }
 0x184   : > { %1079 = shalt.err (!%p1076_p0)
}
 0x185   : > { %s1146_s11 = smov 128   ;;  %s1147_s4 = smov 384  }
 0x186   : > { %s1148_s5 = smov 8  }
 0x187   : > { %867 = dma.vmem_to_hbm [thread:$0]  (%p1448_p4), %s1371_s26, 512, %s1376_s7, %s633_s15, %s1146_s11, %s1147_s4, %s1148_s5  }
 0x188 PF: > { %p884_p10 = scmp.ge.s32.totalorder %s1138_s17, 2  ;;  %s664_s27 = sand.u32 1, %s1118_s12  }
 0x189   : > { %p1449_p3 = scmp.ne.s32.totalorder %s1439_s24, 0  ;;  %s665_s18 = scalar_lea.sflag [#allocation5], %s664_s27 }
 0x18b   : > { %p878_p6 = pnand %p884_p10, %p1449_p3 }
 0x18d   : > { %1113 = dma.done.wait (!%p878_p6), %s665_s18, 512  }
 0x18e   : > { %1115 = vsyncadd (!%p878_p6), %s665_s18, 4294966784  ;;  %s20_s17 = sadd.s32 1, %s1138_s17   ;;  %s1450_s12 = smov %s1122_s13 }
 0x18f   : > { %p17_p1 = scmp.ge.s32.totalorder %s20_s17, 5   ;;  %s1451_s13 = smov %s1126_s14 }
 0x190   : > { %s1452_s14 = smov %s1282_s21  ;;  %s1453_s15 = smov %s1134_s16 }
 0x191   : > { %s1454_s16 = smov %s1456_s30  ;;  %19 = sbr.rel (!%p17_p1) target bundleno = 7 (0x7), region = 94 }
 0x198   :  { %670 = vsyncpa [#allocation4], 1 }
 0x199   :  { %672 = vsyncpa [#allocation4 + $0x1], 1 }
 0x19a   :  { %673 = vsyncpa [#allocation7], 1 }
 0x19b   :  { %675 = vsyncpa [#allocation7 + $0x1], 1 }
 0x19c   :  { %676 = vsyncpa [#allocation5], 1 }
 0x19d   :  { %678 = vsyncpa [#allocation5 + $0x1], 1 }

</bundles_post_ra>
